<compile_context>
chip_gen: v5e
topology: v5e:2x2
jax: 0.10.0
libtpu: 0.0.40
codegen_flags: <defaults>
</compile_context>

<pallas_src>
import math

import jax
import jax.numpy as jnp
from jax.experimental import pallas as pl
from jax.experimental.pallas import tpu as pltpu


def _layer_scale_kernel(x_ref, gamma_ref, o_ref):
    # x_ref: (TM, TN) tile, gamma_ref: (1, TN) f32 resident block, o_ref: (TM, TN).
    # Multiply in f32, cast on store (free under the HBM-bound roofline).
    o_ref[...] = (x_ref[...].astype(jnp.float32) * gamma_ref[...]).astype(o_ref.dtype)


def _sublane_pack(dtype):
    # minimum sublane multiple per dtype width (f32: 8, bf16: 16, int8/fp8: 32)
    return {4: 8, 2: 16, 1: 32}.get(jnp.dtype(dtype).itemsize, 8)


def _round_up(x, m):
    return ((x + m - 1) // m) * m


def _layer_scale_2d(x2, gamma_row_f32, *, target_block_bytes, vmem_limit_bytes,
                    alias_input):
    """Pallas path. x2: (M, D) with D a multiple of 128; gamma_row_f32: (1, D) f32."""
    M, D = x2.shape
    dtype = x2.dtype
    itemsize = jnp.dtype(dtype).itemsize
    pack = _sublane_pack(dtype)

    # Full rows unless a single sublane-pack of rows already exceeds the block budget
    # (f32: D > ~64K). Only then split D into the largest 128-multiple that fits.
    if pack * D * itemsize > target_block_bytes:
        tn = max(128, (target_block_bytes // (pack * itemsize)) // 128 * 128)
        tn = min(tn, D)
    else:
        tn = D

    # Row tile sized against the ~4 MiB block budget, rounded to the dtype sublane pack,
    # never larger than the (padded) row count.
    tm = max(pack, (target_block_bytes // max(1, tn * itemsize)) // pack * pack)
    tm = min(tm, _round_up(M, pack))
    # v7x megacore: guarantee >= 2 row blocks when there is enough work so the
    # "parallel" grid axis can shard over both TensorCores (no-op on v5e/v6e).
    if M > pack:
        tm = min(tm, max(pack, _round_up(pl.cdiv(M, 2), pack)))

    grid = (pl.cdiv(M, tm), pl.cdiv(D, tn))

    return pl.pallas_call(
        _layer_scale_kernel,
        out_shape=jax.ShapeDtypeStruct((M, D), dtype),
        grid_spec=pltpu.PrefetchScalarGridSpec(
            num_scalar_prefetch=0,
            grid=grid,
            in_specs=[
                pl.BlockSpec((tm, tn), lambda i, j: (i, j)),   # x tile (contiguous rows)
                pl.BlockSpec((1, tn), lambda i, j: (0, j)),    # gamma (resident row)
            ],
            out_specs=pl.BlockSpec((tm, tn), lambda i, j: (i, j)),
        ),
        compiler_params=pltpu.CompilerParams(
            dimension_semantics=("parallel", "parallel"),
            vmem_limit_bytes=vmem_limit_bytes,
        ),
        input_output_aliases={0: 0} if alias_input else {},
    )(x2, gamma_row_f32)


def layer_scale(x, gamma, *,
                target_block_bytes=4 << 20,
                vmem_limit_bytes=32 << 20,
                small_bytes_threshold=1 << 20,
                alias_input=False):
    """LayerScale forward: x * gamma with gamma of shape (D,) broadcast over x[..., D]."""
    orig_shape = x.shape
    D = orig_shape[-1]
    assert gamma.shape == (D,), f"gamma shape {gamma.shape} != ({D},)"
    dtype = x.dtype
    itemsize = jnp.dtype(dtype).itemsize
    pack = _sublane_pack(dtype)

    gamma_f32 = gamma.astype(jnp.float32)

    def _xla(v):
        # Plain-XLA multiply (f32 math, cast back) for tiny tensors / ragged tails.
        return (v.astype(jnp.float32) * gamma_f32).astype(dtype)

    # Fast path: for tiny tensors the fixed pallas_call dispatch + grid-step overhead
    # dominates; let XLA fuse the multiply with neighboring ops instead.
    if x.size * itemsize < small_bytes_threshold:
        return _xla(x)

    x2 = x.reshape(-1, D)
    M = x2.shape[0]

    if D % 128 == 0:
        out = _layer_scale_2d(x2, gamma_f32.reshape(1, D),
                              target_block_bytes=target_block_bytes,
                              vmem_limit_bytes=vmem_limit_bytes,
                              alias_input=alias_input)
        return out.reshape(orig_shape)

    # Non-128-aligned channel dim: fold r rows into the lane axis so the output stays
    # lane-dense (unmasked vst). Guard tied to the block budget so a single pack of
    # folded rows can never exceed the intended block size / VMEM budget.
    r = 128 // math.gcd(D, 128)
    if pack * r * D * itemsize > target_block_bytes:
        # Extremely wide non-aligned channel dim - rare; keep it correct in XLA.
        # TODO(synk): add a masked-store Pallas path if this shape ever matters.
        return _xla(x)

    bulk = (M // r) * r
    if bulk == 0:
        return _xla(x)

    gamma_fold = jnp.tile(gamma_f32, r).reshape(1, r * D)
    y_bulk = _layer_scale_2d(
        x2[:bulk].reshape(bulk // r, r * D), gamma_fold,
        target_block_bytes=target_block_bytes,
        vmem_limit_bytes=vmem_limit_bytes,
        alias_input=False,  # sliced/reshaped input: aliasing would force a copy anyway
    ).reshape(bulk, D)
    if bulk == M:
        return y_bulk.reshape(orig_shape)
    # Ragged row remainder (< r rows): plain XLA instead of masked stores everywhere.
    y_rem = _xla(x2[bulk:])
    return jnp.concatenate([y_bulk, y_rem], axis=0).reshape(orig_shape)


# TODO(synk): in a real model, fuse this gamma multiply into the producer's
# (attention / MLP epilogue) output tile instead of a standalone HBM round trip.
# The nn.Parameter init / inplace mul_ variant has no functional-JAX analogue beyond
# the optional alias_input (buffer donation) path above.

if __name__ == "__main__":
    key = jax.random.PRNGKey(0)
    init_values = 1e-5
    k1, k2, k3 = jax.random.split(key, 3)

    # Case 1: ViT-style (B, N, D) f32, D = 128 - tiny, so the XLA fast path fires.
    B, N, D = 2, 8, 128
    x = jax.random.normal(k1, (B, N, D), dtype=jnp.float32)
    gamma = init_values * jnp.ones((D,), dtype=jnp.float32)
    y = layer_scale(x, gamma)
    jax.block_until_ready(y)
    assert y.shape == x.shape and y.dtype == x.dtype
    assert jnp.allclose(y, x * gamma, rtol=1e-6, atol=1e-6)

    # Case 2: same tensor forced through the Pallas path (128-aligned D, full-row
    # blocks, >= 2 row blocks for the megacore grid).
    y_p = layer_scale(x, gamma, small_bytes_threshold=0)
    jax.block_until_ready(y_p)
    assert y_p.shape == x.shape and y_p.dtype == x.dtype
    assert jnp.allclose(y_p, x * gamma, rtol=1e-6, atol=1e-6)

    # Case 3: bf16 with non-128-aligned D = 64 -> fold r = 2 rows into the lane axis.
    B2, N2, D2 = 2, 16, 64
    x2 = jax.random.normal(k2, (B2, N2, D2), dtype=jnp.float32).astype(jnp.bfloat16)
    gamma2 = (init_values * jnp.ones((D2,), dtype=jnp.float32)).astype(jnp.bfloat16)
    y2 = layer_scale(x2, gamma2, small_bytes_threshold=0)
    jax.block_until_ready(y2)
    y2_ref = (x2.astype(jnp.float32) * gamma2.astype(jnp.float32)).astype(jnp.bfloat16)
    assert y2.shape == x2.shape and y2.dtype == x2.dtype
    assert jnp.allclose(y2.astype(jnp.float32), y2_ref.astype(jnp.float32),
                        rtol=1e-2, atol=1e-6)

    # Case 4: non-aligned D = 96 with ragged rows (M = 18, r = 4) ->
    # folded Pallas bulk (16 rows) + tiny XLA tail (2 rows).
    B3, N3, D3 = 2, 9, 96
    x3 = jax.random.normal(k3, (B3, N3, D3), dtype=jnp.float32)
    gamma3 = init_values * jnp.ones((D3,), dtype=jnp.float32)
    y3 = layer_scale(x3, gamma3, small_bytes_threshold=0)
    jax.block_until_ready(y3)
    assert y3.shape == x3.shape and y3.dtype == x3.dtype
    assert jnp.allclose(y3, x3 * gamma3, rtol=1e-6, atol=1e-6)

    print("KERNEL_OK")
</pallas_src>

<mosaic_0001>
module attributes {stable_mosaic.version = 11 : i64} {
  func.func @_layer_scale_kernel(%arg0: i32, %arg1: i32, %arg2: memref<8x128xf32, #tpu.memory_space<vmem>>, %arg3: memref<1x128xf32, #tpu.memory_space<vmem>>, %arg4: memref<8x128xf32, #tpu.memory_space<vmem>>) attributes {dimension_semantics = [#tpu.dimension_semantics<parallel>, #tpu.dimension_semantics<parallel>], iteration_bounds = array<i64: 2, 1>, scalar_prefetch = 0 : i64, scratch_operands = 0 : i64, tpu.core_type = #tpu.core_type<tc>, window_params = [{transform_indices = @transform_0, window_bounds = array<i64: 8, 128>}, {transform_indices = @transform_1, window_bounds = array<i64: 1, 128>}, {transform_indices = @transform_2, window_bounds = array<i64: 8, 128>}]} {
    %c0 = arith.constant 0 : index
    %c0_0 = arith.constant 0 : index
    %0 = vector.load %arg2[%c0, %c0_0] : memref<8x128xf32, #tpu.memory_space<vmem>>, vector<8x128xf32>
    %c0_1 = arith.constant 0 : index
    %c0_2 = arith.constant 0 : index
    %1 = vector.load %arg3[%c0_1, %c0_2] : memref<1x128xf32, #tpu.memory_space<vmem>>, vector<1x128xf32>
    %2 = vector.broadcast %1 : vector<1x128xf32> to vector<8x128xf32>
    %3 = arith.mulf %0, %2 : vector<8x128xf32>
    %c0_3 = arith.constant 0 : index
    %c0_4 = arith.constant 0 : index
    %4 = vector.load %arg4[%c0_3, %c0_4] : memref<8x128xf32, #tpu.memory_space<vmem>>, vector<8x128xf32>
    tpu.vector_store %arg4[%c0_3, %c0_4], %3 {strides = array<i32>} : memref<8x128xf32, #tpu.memory_space<vmem>>, vector<8x128xf32>,
    return
  }
  func.func @transform_0(%arg0: i32, %arg1: i32) -> (i32, i32) {
    %c0_i32 = arith.constant 0 : i32
    return %arg0, %arg1 : i32, i32
  }
  func.func @transform_1(%arg0: i32, %arg1: i32) -> (i32, i32) {
    %c0_i32 = arith.constant 0 : i32
    %c0_i32_0 = arith.constant 0 : i32
    return %c0_i32, %arg1 : i32, i32
  }
  func.func @transform_2(%arg0: i32, %arg1: i32) -> (i32, i32) {
    %c0_i32 = arith.constant 0 : i32
    return %arg0, %arg1 : i32, i32
  }
}

</mosaic_0001>

<bundles_post_ra>
// kernel: tpu_custom_call.1
= control target key start
LH: loop header
LB: loop body
LE: loop exit
PB: predicated region body
PF: predicated region fallthrough
CT: control target
= control target key end

     0   :  { %7 = vsyncpa [#allocation3], 0  ;;  %s716_s0 = inlined_call_operand.hbm [shape: f32[16,128], index: 0, kind: input, shape index: {}]   ;;  %s717_s1 = inlined_call_operand.hbm [shape: f32[1,128], index: 1, kind: input, shape index: {}]   ;;  %s718_s2 = inlined_call_operand.hbm [shape: f32[16,128], index: 2, kind: output, shape index: {}]  }
   0x1   :  { %9 = vsyncpa [#allocation3 + $0x1], 0 }
   0x2   :  { %10 = vsyncpa [#allocation6], 0 }
   0x3   :  { %11 = vsyncpa [#allocation4], 0 }
   0x4   :  { %13 = vsyncpa [#allocation4 + $0x1], 0  ;;  %s567_s9 = smov 0   ;;  %s569_s10 = smov 0  }
   0x5   :  { %s571_s11 = smov 0   ;;  %s573_s12 = smov 0  }
   0x6   :  { %s575_s13 = smov 0   ;;  %s577_s14 = smov 0  }
   0x7 LB: > { %s314_s15 = sadd.s32 4294967295, %s549_s14   ;;  %s315_s16 = sadd.s32 4294967294, %s549_s14   ;;  %s549_s14 = sphi %s577_s14, %s19_s14   ;;  %s545_s13 = sphi %s575_s13, %s730_s13   ;;  %s541_s12 = sphi %s573_s12, %s729_s12   ;;  %s537_s11 = sphi %s571_s11, %s728_s11   ;;  %s533_s10 = sphi %s569_s10, %s727_s10   ;;  %s529_s9 = sphi %s567_s9, %s726_s9  }
   0x8   : > { %p53_p0 = scmp.ne.s32.totalorder %s533_s10, %s529_s9  ;;  %p601_p1 = scmp.eq.s32.totalorder %s314_s15, 0 }
   0x9   : > { %p605_p2 = scmp.eq.s32.totalorder %s314_s15, 1  ;;  %p111_p3 = scmp.eq.s32.totalorder %s315_s16, 1 }
   0xa   : > { %p611_p4 = por %p601_p1, %p53_p0  ;;  %p316_p5 = scmp.ge.s32.totalorder %s549_s14, 1 }
   0xb   : > { %p616_p6 = por %p111_p3, %p53_p0  ;;  %p118_p7 = scmp.lt.s32.totalorder %s549_s14, 3 }
   0xc   : > { %s131_s23 = sshll.u32 %s717_s1, 4  ;;  %p318_p9 = scmp.ge.s32.totalorder %s549_s14, 2  ;;  %s132_s23 = int_to_ptr.hbm [resolvable:$true] %s131_s23 }
   0xd   : > { %p624_p8 = pnand %p316_p5, %p118_p7  ;;  %s551_s25 = smov [#allocation5]  }
   0xe   : > { %s133_s26 = sshll.u32 %s551_s25, 4  ;;  %s31_s27 = sadd.s32 1, %s545_s13  ;;  %s134_s26 = int_to_ptr.vmem [resolvable:$true] %s133_s26 }
   0xf   : > { %p337_p10 = pneg %p624_p8  ;;  %p33_p12 = scmp.ge.s32.totalorder %s31_s27, 2 }
  0x10   : > { %s40_s28 = sadd.s32 1, %s537_s11  ;;  %p47_p13 = scmp.ne.s32.totalorder %s537_s11, %s533_s10 }
  0x11   : > { %p338_p11 = pnand %p337_p10, %p601_p1  ;;  %p48_p0 = scmp.eq.s32.totalorder %s549_s14, 0 }
  0x12   : > { %s732_s27 = smov (%p33_p12, %s31_s27), 0  ;;  %p646_p5 = por %p605_p2, %p47_p13 }
  0x13   : > { %340 = dma.hbm_to_vmem [thread:$0]  (!%p338_p11), %s132_s23, 16, %s134_s26, [#allocation6]  }
  0x14   : > { %p640_p3 = por %p48_p0, %p47_p13  ;;  %s35_s3 = ssub.s32 %s545_s13, %s732_s27 }
  0x15   : > { %p350_p7 = scmp.lt.s32.totalorder %s549_s14, 2  ;;  %p38_p10 = scmp.eq.s32.totalorder %s35_s3, 0 }
  0x16   : > { %s144_s4 = sand.u32 1, %s537_s11   ;;  %s320_s7 = sshll.u32 %s545_s13, 3 }
  0x17   : > { %s319_s5 = sshll.u32 %s144_s4, 3  ;;  %s153_s16 = scalar_lea.hbm %s716_s0, %s320_s7 }
  0x18   : > { %s655_s6 = scalar_select %p38_p10, %s537_s11, %s40_s28  }
  0x19   : > { %s148_s21 = scalar_lea.vmem [#allocation2], %s319_s5  ;;  %s155_s18 = sshll.u32 %s153_s16, 4  ;;  %s156_s18 = int_to_ptr.hbm [resolvable:$true] %s155_s18 }
  0x1a   : > { %s157_s22 = sshll.u32 %s148_s21, 4  ;;  %p342_p2 = pnand %p350_p7, %p640_p3  ;;  %s158_s22 = int_to_ptr.vmem [resolvable:$true] %s157_s22 }
  0x1b   : > { %s145_s23 = scalar_lea.sflag [#allocation3], %s144_s4  ;;  %166 = sbr.rel (%p624_p8) target bundleno = 50 (0x32), region = 28 }
  0x1c   : > { %344 = dma.hbm_to_vmem [thread:$0]  (!%p342_p2), %s156_s18, 128, %s158_s22, %s145_s23  }
  0x1d   : > { %s666_s25 = sand.u32 (!%p624_p8), 1, %s533_s10  }
  0x1e   : > { %s322_s26 = sshll.u32 (!%p624_p8), %s666_s25, 3  ;;  %s169_s28 = scalar_lea.sflag (!%p624_p8), [#allocation3], %s666_s25 }
  0x1f   : > { %s172_s3 = scalar_lea.vmem (!%p624_p8), [#allocation2], %s322_s26 }
  0x20   : > { %516 = dma.done.wait (%p611_p4), %s169_s28, 128  }
  0x21   : > { %518 = vsyncadd (%p611_p4), %s169_s28, 4294967168 }
  0x22   : > { %520 = dma.done.wait (%p601_p1), [#allocation6], 16  }
  0x23   : > { %522 = vsyncadd (%p601_p1), [#allocation6], 4294967280  ;;  %s326_s24 = sshll.u32 %s541_s12, 3  ;;  %s198_s7 = scalar_lea.vmem [#allocation7], %s322_s26  ;;  %v199_v0 = vld [vmem:[%s172_s3] sm:$0xff] }
  0x24   : > { %s218_s5 = scalar_lea.hbm %s718_s2, %s326_s24  ;;  %s220_s8 = sshll.u32 %s198_s7, 4  ;;  %v402_v1 = vld [vmem:[#allocation5] ss:$0 sm:$0xff]  ;;  %s221_s8 = int_to_ptr.vmem [resolvable:$true] %s220_s8 }
  0x25   : > { %s222_s15 = sshll.u32 %s218_s5, 4  ;;  %v204_v2 = vmul.f32 %v402_v1, %v199_v0  ;;  %s207_s19 = scalar_lea.sflag [#allocation4], %s666_s25  ;;  %s223_s15 = int_to_ptr.hbm [resolvable:$true] %s222_s15 }
  0x26   : > { %s477_s17 = sshra.s32 %s223_s15, 4  ;;  %s483_s22 = scalar_lea.hbm %s718_s2, 16  ;;  %s478_s17 = int_to_ptr.hbm [resolvable:$true] %s477_s17 }
  0x27   : > { %205 = vst [vmem:[%s198_s7] sm:$0xff] %v204_v2  ;;  %s479_s16 = scalar_lea.hbm %s478_s17, 8  ;;  %p484_p11 = scmp.lt.s32.totalorder %s478_s17, %s718_s2 }
  0x28   : > { %p480_p1 = scmp.ne.s32.totalorder %s478_s17, %s479_s16  ;;  %p485_p12 = scmp.lt.s32.totalorder %s483_s22, %s479_s16 }
  0x2a   : > { %p481_p4 = pnand %p480_p1, %p646_p5  ;;  %p486_p13 = por %p485_p12, %p484_p11 }
  0x2c   : > { %p482_p8 = pneg %p481_p4 }
  0x2e   : > { %p487_p0 = pnand %p486_p13, %p482_p8 }
  0x30   : > { %490 = shalt.err (!%p487_p0)
}
  0x31   : > { %335 = dma.vmem_to_hbm [thread:$0]  (%p646_p5), %s221_s8, 128, %s223_s15, %s207_s19  }
  0x32 PF: > { %s234_s25 = sand.u32 1, %s529_s9   ;;  %p346_p3 = pnand %p318_p9, %p616_p6 }
  0x33   : > { %s235_s26 = scalar_lea.sflag [#allocation4], %s234_s25 }
  0x34   : > { %p347_p7 = pneg %p346_p3 }
  0x36   : > { %524 = dma.done.wait (%p347_p7), %s235_s26, 128  }
  0x37   : > { %526 = vsyncadd (%p347_p7), %s235_s26, 4294967168  ;;  %s19_s14 = sadd.s32 1, %s549_s14   ;;  %s726_s9 = smov %s533_s10 }
  0x38   : > { %p16_p10 = scmp.ge.s32.totalorder %s19_s14, 4   ;;  %s727_s10 = smov %s537_s11 }
  0x39   : > { %s728_s11 = smov %s655_s6  ;;  %s729_s12 = smov %s545_s13 }
  0x3a   : > { %s730_s13 = smov %s732_s27  ;;  %18 = sbr.rel (!%p16_p10) target bundleno = 7 (0x7), region = 78 }
  0x3f   :  { %241 = vsyncpa [#allocation3], 1 }
  0x40   :  { %243 = vsyncpa [#allocation3 + $0x1], 1 }
  0x41   :  { %244 = vsyncpa [#allocation6], 1 }
  0x42   :  { %245 = vsyncpa [#allocation4], 1 }
  0x43   :  { %247 = vsyncpa [#allocation4 + $0x1], 1 }

</bundles_post_ra>
